<compile_context>
chip_gen: v7x
topology: tpu7x:2x2x1
jax: 0.10.0
libtpu: 0.0.40
codegen_flags: <defaults>
</compile_context>

<pallas_src>
import functools

import jax
import jax.numpy as jnp
from jax.experimental import pallas as pl
from jax.experimental.pallas import tpu as pltpu

IN_FEATURES = 42
HIDDEN = 128
OUT_FEATURES = 7


def _round_up(n, m):
    return ((n + m - 1) // m) * m


def _target_qnet_kernel(x_ref, w1_ref, b1_ref, w2_ref, b2_ref, o_ref):
    # x: [TM, 42] bf16, w1: [42, 128] bf16, b1: [1, 128] f32,
    # w2: [128, 7] bf16, b2: [1, 7] f32, o: [TM, 7] f32
    x = x_ref[...]

    # fc1 (bf16 MXU matmul, f32 accumulation) + bias + ReLU in f32.
    h = jnp.dot(x, w1_ref[...], preferred_element_type=jnp.float32)
    h = jnp.maximum(h + b1_ref[...], 0.0)

    # fc2: feed the MXU bf16 again, accumulate in f32, add bias in f32.
    h_bf16 = h.astype(jnp.bfloat16)
    out = jnp.dot(h_bf16, w2_ref[...], preferred_element_type=jnp.float32)
    o_ref[...] = (out + b2_ref[...]).astype(o_ref.dtype)


@functools.partial(jax.jit, static_argnames=("block_b",))
def target_qnetwork_forward(x, w1, b1, w2, b2, *, block_b=512):
    """Fused forward pass: relu(x @ w1 + b1) @ w2 + b2 (f32 output)."""
    B = x.shape[0]

    # bf16 storage for the DMA-dominant operands; f32 for biases/accumulation.
    x_bf = x.astype(jnp.bfloat16)
    w1_bf = w1.astype(jnp.bfloat16)
    w2_bf = w2.astype(jnp.bfloat16)
    b1_2d = b1.reshape(1, HIDDEN).astype(jnp.float32)
    b2_2d = b2.reshape(1, OUT_FEATURES).astype(jnp.float32)

    # Batch tile: multiple of 8 (sublane), capped at block_b; pad B to a
    # multiple of the tile so every block divides cleanly.
    tm = min(block_b, _round_up(B, 8))
    b_pad = _round_up(B, tm)
    if b_pad != B:
        x_bf = jnp.pad(x_bf, ((0, b_pad - B), (0, 0)))

    grid = (b_pad // tm,)

    flops = 2 * B * (IN_FEATURES * HIDDEN + HIDDEN * OUT_FEATURES)
    bytes_accessed = (
        2 * b_pad * IN_FEATURES            # x (bf16)
        + 2 * IN_FEATURES * HIDDEN         # w1 (bf16)
        + 4 * HIDDEN                       # b1 (f32)
        + 2 * HIDDEN * OUT_FEATURES        # w2 (bf16)
        + 4 * OUT_FEATURES                 # b2 (f32)
        + 4 * b_pad * OUT_FEATURES         # output (f32)
    )

    out = pl.pallas_call(
        _target_qnet_kernel,
        out_shape=jax.ShapeDtypeStruct((b_pad, OUT_FEATURES), jnp.float32),
        grid_spec=pltpu.PrefetchScalarGridSpec(
            num_scalar_prefetch=0,
            grid=grid,
            in_specs=[
                # x: streamed batch tiles.
                pl.BlockSpec((tm, IN_FEATURES), lambda i: (i, 0)),
                # Weights / biases: same block every step -> fetched once,
                # VMEM-resident across the whole grid.
                pl.BlockSpec((IN_FEATURES, HIDDEN), lambda i: (0, 0)),
                pl.BlockSpec((1, HIDDEN), lambda i: (0, 0)),
                pl.BlockSpec((HIDDEN, OUT_FEATURES), lambda i: (0, 0)),
                pl.BlockSpec((1, OUT_FEATURES), lambda i: (0, 0)),
            ],
            out_specs=pl.BlockSpec((tm, OUT_FEATURES), lambda i: (i, 0)),
        ),
        compiler_params=pltpu.CompilerParams(
            dimension_semantics=("parallel",),
        ),
        cost_estimate=pl.CostEstimate(
            flops=flops, transcendentals=0, bytes_accessed=bytes_accessed
        ),
    )(x_bf, w1_bf, b1_2d, w2_bf, b2_2d)

    return out[:B]


def init_params(key):
    """Deterministic synthetic init matching nn.Linear shapes (stored transposed)."""
    k1, k2, k3, k4 = jax.random.split(key, 4)
    lim1 = 1.0 / jnp.sqrt(jnp.float32(IN_FEATURES))
    lim2 = 1.0 / jnp.sqrt(jnp.float32(HIDDEN))
    w1 = jax.random.uniform(k1, (IN_FEATURES, HIDDEN), jnp.float32, -lim1, lim1)
    b1 = jax.random.uniform(k2, (HIDDEN,), jnp.float32, -lim1, lim1)
    w2 = jax.random.uniform(k3, (HIDDEN, OUT_FEATURES), jnp.float32, -lim2, lim2)
    b2 = jax.random.uniform(k4, (OUT_FEATURES,), jnp.float32, -lim2, lim2)
    return w1, b1, w2, b2


def _reference(x, w1, b1, w2, b2):
    # Mirror the kernel's bf16 quantization points, f32 accumulation.
    xb = x.astype(jnp.bfloat16).astype(jnp.float32)
    w1b = w1.astype(jnp.bfloat16).astype(jnp.float32)
    w2b = w2.astype(jnp.bfloat16).astype(jnp.float32)
    h = jnp.maximum(xb @ w1b + b1, 0.0)
    hb = h.astype(jnp.bfloat16).astype(jnp.float32)
    return hb @ w2b + b2


if __name__ == "__main__":
    key = jax.random.PRNGKey(0)
    k_x, k_x2, k_p = jax.random.split(key, 3)
    w1, b1, w2, b2 = init_params(k_p)

    # Small batch of flattened 6x7 Connect-4 boards.
    B = 8
    x = jax.random.normal(k_x, (B, IN_FEATURES), jnp.float32)
    out = jax.block_until_ready(target_qnetwork_forward(x, w1, b1, w2, b2))
    ref = _reference(x, w1, b1, w2, b2)
    assert out.shape == (B, OUT_FEATURES)
    assert jnp.allclose(out, ref, atol=2e-3, rtol=2e-3), "mismatch vs reference (B=8)"

    # Larger ragged batch to exercise the batch grid + padding path.
    B2 = 200
    x2 = jax.random.normal(k_x2, (B2, IN_FEATURES), jnp.float32)
    out2 = jax.block_until_ready(
        target_qnetwork_forward(x2, w1, b1, w2, b2, block_b=64)
    )
    ref2 = _reference(x2, w1, b1, w2, b2)
    assert out2.shape == (B2, OUT_FEATURES)
    assert jnp.allclose(out2, ref2, atol=2e-3, rtol=2e-3), "mismatch vs reference (B=200)"

    print("KERNEL_OK")
</pallas_src>

<mosaic_0001>
module attributes {stable_mosaic.version = 11 : i64} {
  func.func @_target_qnet_kernel(%arg0: i32, %arg1: memref<8x42xbf16, #tpu.memory_space<vmem>>, %arg2: memref<42x128xbf16, #tpu.memory_space<vmem>>, %arg3: memref<1x128xf32, #tpu.memory_space<vmem>>, %arg4: memref<128x7xbf16, #tpu.memory_space<vmem>>, %arg5: memref<1x7xf32, #tpu.memory_space<vmem>>, %arg6: memref<8x7xf32, #tpu.memory_space<vmem>>) attributes {dimension_semantics = [#tpu.dimension_semantics<parallel>], iteration_bounds = array<i64: 1>, scalar_prefetch = 0 : i64, scratch_operands = 0 : i64, tpu.core_type = #tpu.core_type<tc>, window_params = [{transform_indices = @transform_0, window_bounds = array<i64: 8, 42>}, {pipeline_mode = #tpu.pipeline_mode<synchronous>, transform_indices = @transform_1, window_bounds = array<i64: 42, 128>}, {pipeline_mode = #tpu.pipeline_mode<synchronous>, transform_indices = @transform_2, window_bounds = array<i64: 1, 128>}, {pipeline_mode = #tpu.pipeline_mode<synchronous>, transform_indices = @transform_3, window_bounds = array<i64: 128, 7>}, {pipeline_mode = #tpu.pipeline_mode<synchronous>, transform_indices = @transform_4, window_bounds = array<i64: 1, 7>}, {transform_indices = @transform_5, window_bounds = array<i64: 8, 7>}]} {
    %c0 = arith.constant 0 : index
    %c0_0 = arith.constant 0 : index
    %0 = vector.load %arg1[%c0, %c0_0] : memref<8x42xbf16, #tpu.memory_space<vmem>>, vector<8x42xbf16>
    %c0_1 = arith.constant 0 : index
    %c0_2 = arith.constant 0 : index
    %1 = vector.load %arg2[%c0_1, %c0_2] : memref<42x128xbf16, #tpu.memory_space<vmem>>, vector<42x128xbf16>
    %cst = arith.constant dense<0.000000e+00> : vector<8x128xf32>
    %2 = tpu.matmul %0, %1, %cst {dimension_numbers = #tpu.dot_dimension_numbers<[1], [0], [0], [1], [0, 0, 1, 1], [], []>} : vector<8x42xbf16>, vector<42x128xbf16>, vector<8x128xf32> -> vector<8x128xf32>
    %c0_3 = arith.constant 0 : index
    %c0_4 = arith.constant 0 : index
    %3 = vector.load %arg3[%c0_3, %c0_4] : memref<1x128xf32, #tpu.memory_space<vmem>>, vector<1x128xf32>
    %4 = vector.broadcast %3 : vector<1x128xf32> to vector<8x128xf32>
    %5 = arith.addf %2, %4 : vector<8x128xf32>
    %cst_5 = arith.constant 0.000000e+00 : f32
    %6 = vector.broadcast %cst_5 : f32 to vector<8x128xf32>
    %7 = arith.maximumf %5, %6 : vector<8x128xf32>
    %8 = arith.truncf %7 : vector<8x128xf32> to vector<8x128xbf16>
    %c0_6 = arith.constant 0 : index
    %c0_7 = arith.constant 0 : index
    %9 = vector.load %arg4[%c0_6, %c0_7] : memref<128x7xbf16, #tpu.memory_space<vmem>>, vector<128x7xbf16>
    %cst_8 = arith.constant dense<0.000000e+00> : vector<8x7xf32>
    %10 = tpu.matmul %8, %9, %cst_8 {dimension_numbers = #tpu.dot_dimension_numbers<[1], [0], [0], [1], [0, 0, 1, 1], [], []>} : vector<8x128xbf16>, vector<128x7xbf16>, vector<8x7xf32> -> vector<8x7xf32>
    %c0_9 = arith.constant 0 : index
    %c0_10 = arith.constant 0 : index
    %11 = vector.load %arg5[%c0_9, %c0_10] : memref<1x7xf32, #tpu.memory_space<vmem>>, vector<1x7xf32>
    %12 = vector.broadcast %11 : vector<1x7xf32> to vector<8x7xf32>
    %13 = arith.addf %10, %12 : vector<8x7xf32>
    %c0_11 = arith.constant 0 : index
    %c0_12 = arith.constant 0 : index
    %14 = vector.load %arg6[%c0_11, %c0_12] : memref<8x7xf32, #tpu.memory_space<vmem>>, vector<8x7xf32>
    tpu.vector_store %arg6[%c0_11, %c0_12], %13 {strides = array<i32>} : memref<8x7xf32, #tpu.memory_space<vmem>>, vector<8x7xf32>,
    return
  }
  func.func @transform_0(%arg0: i32) -> (i32, i32) {
    %c0_i32 = arith.constant 0 : i32
    %c0_i32_0 = arith.constant 0 : i32
    return %arg0, %c0_i32 : i32, i32
  }
  func.func @transform_1(%arg0: i32) -> (i32, i32) {
    %c0_i32 = arith.constant 0 : i32
    %c0_i32_0 = arith.constant 0 : i32
    %c0_i32_1 = arith.constant 0 : i32
    return %c0_i32, %c0_i32_0 : i32, i32
  }
  func.func @transform_2(%arg0: i32) -> (i32, i32) {
    %c0_i32 = arith.constant 0 : i32
    %c0_i32_0 = arith.constant 0 : i32
    %c0_i32_1 = arith.constant 0 : i32
    return %c0_i32, %c0_i32_0 : i32, i32
  }
  func.func @transform_3(%arg0: i32) -> (i32, i32) {
    %c0_i32 = arith.constant 0 : i32
    %c0_i32_0 = arith.constant 0 : i32
    %c0_i32_1 = arith.constant 0 : i32
    return %c0_i32, %c0_i32_0 : i32, i32
  }
  func.func @transform_4(%arg0: i32) -> (i32, i32) {
    %c0_i32 = arith.constant 0 : i32
    %c0_i32_0 = arith.constant 0 : i32
    %c0_i32_1 = arith.constant 0 : i32
    return %c0_i32, %c0_i32_0 : i32, i32
  }
  func.func @transform_5(%arg0: i32) -> (i32, i32) {
    %c0_i32 = arith.constant 0 : i32
    %c0_i32_0 = arith.constant 0 : i32
    return %arg0, %c0_i32 : i32, i32
  }
}

</mosaic_0001>

<bundles_post_ra>
// kernel: target_qnetwork_forward.1
= control target key start
LH: loop header
LB: loop body
LE: loop exit
PB: predicated region body
PF: predicated region fallthrough
CT: control target
= control target key end

     0   :  { %v325_v1 = vmov 0.0   ;;  %vm57_vm0 = vcmask 1044480   ;;  %vm326_vm1 = vmmov 0   ;;  %vm53_vm2 = vcmask 343040   ;;  %s412_s0 = inlined_call_operand.vmem [shape: bf16[8,42], index: 0, kind: input, shape index: {}]   ;;  %s413_s1 = inlined_call_operand.vmem [shape: bf16[42,128], index: 1, kind: input, shape index: {}]   ;;  %s414_s2 = inlined_call_operand.vmem [shape: f32[1,128], index: 2, kind: input, shape index: {}]   ;;  %s415_s3 = inlined_call_operand.vmem [shape: bf16[128,7], index: 3, kind: input, shape index: {}]   ;;  %s416_s4 = inlined_call_operand.vmem [shape: f32[1,7], index: 4, kind: input, shape index: {}]   ;;  %s417_s5 = inlined_call_operand.hbm [shape: f32[8,7], index: 5, kind: output, shape index: {}]  }
   0x1   :  { %v290_v0 = vld [vmem:[%s413_s1] sm:$0xff]   ;;  %257 = vmatprep.subr.bf16.mxu0 %v325_v1  ;;  %267 = vmatprep.subr.bf16.mxu1 %v325_v1  ;;  %v291_v2 = vld [vmem:[%s413_s1 + $0x8] sm:$0xff]   ;;  %v292_v3 = vld [vmem:[%s413_s1 + $0x10] sm:$0x1f]  }
   0x2   :  { %258 = vmatpush3.bf16.msra.mxu0 %v290_v0  ;;  %263 = vmatprep.mubr.msk.bf16.mxu0 %vm326_vm1, %v325_v1  ;;  %v293_v4 = vld [vmem:[%s415_s3] sm:$0xff]   ;;  %v294_v5 = vld [vmem:[%s415_s3 + $0x8] sm:$0xff]   ;;  %v59_v6 = vsel %vm57_vm0, %v292_v3, 0  ;;  %v295_v8 = vld [vmem:[%s415_s3 + $0x10] sm:$0xff]  }
   0x3   :  { %259 = vmatprep.subr.bf16.mxu0 %v325_v1  ;;  %283 = vmatprep.mubr.msk.bf16.mxu1 %vm326_vm1, %v325_v1  ;;  %v22_v7 = vld [vmem:[%s412_s0] sm:$0xf] }
   0x4   :  { %268 = vmatpush3.bf16.msra.mxu1 %v293_v4 }
   0x5   :  { %269 = vmatprep.subr.bf16.mxu1 %v325_v1 }
   0x6   :  { %260 = vmatpush3.bf16.msra.mxu0 %v291_v2 }
   0x7   :  { %261 = vmatprep.subr.bf16.mxu0 %v325_v1 }
   0x8   :  { %270 = vmatpush3.bf16.msra.mxu1 %v294_v5 }
   0x9   :  { %271 = vmatprep.subr.bf16.mxu1 %v325_v1 }
   0xa   :  { %262 = vmatpush3.bf16.msra.mxu0 %v59_v6 }
   0xb   :  { %10 = vsyncpa [#allocation3], 0  ;;  %v296_v9 = vld [vmem:[%s415_s3 + $0x18] sm:$0xff]   ;;  %v297_v10 = vld [vmem:[%s415_s3 + $0x20] sm:$0xff]   ;;  %s327_s19 = smov [#allocation2]   ;;  %vm214_vm3 = vcmask 56320  }
   0xc   :  { %272 = vmatpush3.bf16.msra.mxu1 %v295_v8  ;;  %v298_v11 = vld [vmem:[%s415_s3 + $0x28] sm:$0xff]   ;;  %v299_v12 = vld [vmem:[%s415_s3 + $0x30] sm:$0xff]   ;;  %v300_v13 = vld [vmem:[%s415_s3 + $0x38] sm:$0xff]   ;;  %s222_s20 = sshll.u32 %s327_s19, 4  ;;  %s223_s20 = int_to_ptr.vmem [resolvable:$true] %s222_s20 }
   0xd   :  { %264 = vmatmul.mubr.msk.bf16.vlgmr.msra.gmra.mrb[0].mxu0 %vm53_vm2, %v22_v7  ;;  %273 = vmatprep.subr.bf16.mxu1 %v325_v1  ;;  %v230_v14 = vld [vmem:[%s414_s2] ss:$0 sm:$0xff]  ;;  %s301_s2 = scalar_lea.vmem %s223_s20, 128  ;;  %p306_p1 = scmp.lt.s32.totalorder %s223_s20, %s223_s20 }
   0xe   :  { %v235_v22 = vld [vmem:[%s416_s4] ss:$0 sm:$0xff]  ;;  %p302_p0 = scmp.ne.s32.totalorder %s223_s20, %s301_s2  ;;  %p307_p2 = scmp.lt.s32.totalorder %s301_s2, %s301_s2 }
  0x10   :  { %274 = vmatpush3.bf16.msra.mxu1 %v296_v9  ;;  %p308_p3 = por %p307_p2, %p306_p1 }
  0x11   :  { %275 = vmatprep.subr.bf16.mxu1 %v325_v1 }
  0x12   :  { %p309_p4 = pnand %p308_p3, %p302_p0 }
  0x14   :  { %276 = vmatpush3.bf16.msra.mxu1 %v297_v10 }
  0x15   :  { %277 = vmatprep.subr.bf16.mxu1 %v325_v1 }
  0x18   :  { %278 = vmatpush3.bf16.msra.mxu1 %v298_v11 }
  0x19   :  { %279 = vmatprep.subr.bf16.mxu1 %v325_v1 }
  0x1c   :  { %280 = vmatpush3.bf16.msra.mxu1 %v299_v12 }
  0x1d   :  { %281 = vmatprep.subr.bf16.mxu1 %v325_v1 }
  0x20   :  { %282 = vmatpush3.bf16.msra.mxu1 %v300_v13 }
  0xe0   :  { %v95_v15 = vpop.f32.mrb[0].mxu0 }
  0xe1   :  { %v96_v16 = vadd.f32 %v230_v14, %v95_v15  ;;  %v265_v17 = vpop.f32.mrb[1].mxu0 }
  0xe2   :  { %v98_v18 = vpop.f32.mrb[2].mxu0 }
  0xe3   :  { %v101_v19 = vmax.f32 %v96_v16, 0.0  ;;  %v266_v20 = vpop.f32.mrb[3].mxu0 }
  0xe5   :  { %v102_v21 = vpack.c.bf16 %v101_v19, %v101_v19 }
  0xe7   :  { %284 = vmatmul.mubr.bf16.vlgmr.msra.gmra.mrb[0].mxu1 %v102_v21 }
 0x1ba   :  { %v208_v23 = vpop.f32.mrb[0].mxu1 }
 0x1bb   :  { %v209_v24 = vadd.f32 %v235_v22, %v208_v23  ;;  %v285_v25 = vpop.f32.mrb[1].mxu1 }
 0x1bc   :  { %v211_v26 = vpop.f32.mrb[2].mxu1 }
 0x1bd   :  { %v286_v27 = vpop.f32.mrb[3].mxu1  ;;  %215 = vst.msk [vmem:[#allocation2] sm:$0xff] %vm214_vm3, %v209_v24 }
 0x1be   :  { %312 = shalt.err (!%p309_p4)
}
 0x1bf   :  { %s313_s4 = scalar_lea.hbm %s417_s5, 128 }
 0x1c0   :  { %p314_p5 = scmp.ne.s32.totalorder %s417_s5, %s313_s4  ;;  %p317_p6 = scmp.lt.u32.totalorder %s313_s4, %s417_s5 }
 0x1c2   :  { %p319_p7 = pnand %p317_p6, %p314_p5 }
 0x1c4   :  { %322 = shalt.err (!%p319_p7)
}
 0x1c5   :  { %225 = dma.vmem_to_hbm [thread:$0]  %s223_s20, 128, %s417_s5, [#allocation3]  }
 0x1c6   :  { %323 = dma.done.wait [#allocation3], 128  }
 0x1c7   :  { %324 = vsyncadd [#allocation3], 4294967168 }
 0x1c8   :  { %229 = vsyncpa [#allocation3], 1 }

</bundles_post_ra>
